<compile_context>
chip_gen: v7x
topology: tpu7x:2x2x1
jax: 0.10.0
libtpu: 0.0.40
codegen_flags: <defaults>
</compile_context>

<pallas_src>
import jax
import jax.numpy as jnp
from jax import lax
from jax.experimental import pallas as pl
from jax.experimental.pallas import tpu as pltpu


# ----------------------------------------------------------------------------
# Small helpers.
# ----------------------------------------------------------------------------
_VMEM_LIMIT_CACHE = None


def _vmem_limit_bytes():
    """Scoped VMEM limit: 7/8 of physical per-core VMEM (headroom for compiler
    scratch / spills / double buffers).  ~112 MiB on v5e/v6e, ~56 MiB on v7x."""
    global _VMEM_LIMIT_CACHE
    if _VMEM_LIMIT_CACHE is None:
        try:
            cap = int(pltpu.get_tpu_info().vmem_capacity_bytes)
            if cap <= 0:
                raise ValueError(cap)
        except Exception:
            cap = 64 * 1024 * 1024        # conservative: fits every generation
        _VMEM_LIMIT_CACHE = (cap // 8) * 7
    return _VMEM_LIMIT_CACHE


def _pick_tile(dim, target, quantum):
    """Largest divisor of `dim` that is <= `target` and a multiple of `quantum`.
    Only falls back to the full dim when no aligned divisor exists."""
    if dim <= target:
        return dim
    for cand in range(min(target, dim), quantum - 1, -1):
        if dim % cand == 0 and cand % quantum == 0:
            return cand
    # TODO(synk): masked remainder tiles (pl.cdiv grid) for shapes with no aligned divisor.
    return dim


def _head_group_size(num_heads, head_dim):
    """Smallest head-group G (dividing num_heads) whose lane width G*head_dim is a
    multiple of 128 -> q/k/v/output blocks are unmasked 128-lane slabs."""
    for g in range(1, num_heads + 1):
        if num_heads % g == 0 and (g * head_dim) % 128 == 0:
            return g
    # TODO(synk): head_dim * num_heads not a multiple of 128 falls back to all heads
    # per step (padded / masked lane ops).
    return num_heads


# ----------------------------------------------------------------------------
# Kernel 1: tiled linear  y = x @ W + b  with W already in (K, N) layout and bf16.
# Grid (M/tm, N/tn, K/tk), f32 accumulator scratch, bias added at the last K step.
# ----------------------------------------------------------------------------
def _linear_kernel(x_ref, w_ref, b_ref, o_ref, acc_ref):
    @pl.when(pl.program_id(2) == 0)
    def _():
        acc_ref[...] = jnp.zeros_like(acc_ref)

    acc_ref[...] += jnp.dot(x_ref[...], w_ref[...],
                            preferred_element_type=jnp.float32)

    @pl.when(pl.program_id(2) == pl.num_programs(2) - 1)
    def _():
        o_ref[...] = (acc_ref[...] + b_ref[...]).astype(o_ref.dtype)


def linear(x, w_t, b, *, out_dtype, tm=512, tn=256, tk=512):
    """x: (M, K) bf16, w_t: (K, N) bf16, b: (N,) f32 -> (M, N) `out_dtype`."""
    m, k = x.shape
    k2, n = w_t.shape
    assert k == k2
    tm = _pick_tile(m, tm, 8)
    tn = _pick_tile(n, tn, 128)
    tk = _pick_tile(k, tk, 128)
    grid = (m // tm, n // tn, k // tk)
    return pl.pallas_call(
        _linear_kernel,
        out_shape=jax.ShapeDtypeStruct((m, n), out_dtype),
        grid_spec=pltpu.PrefetchScalarGridSpec(
            num_scalar_prefetch=0,
            grid=grid,
            in_specs=[
                pl.BlockSpec((tm, tk), lambda i, j, kk: (i, kk)),
                pl.BlockSpec((tk, tn), lambda i, j, kk: (kk, j)),
                pl.BlockSpec((1, tn), lambda i, j, kk: (0, j)),
            ],
            out_specs=pl.BlockSpec((tm, tn), lambda i, j, kk: (i, j)),
            scratch_shapes=[pltpu.VMEM((tm, tn), jnp.float32)],
        ),
        compiler_params=pltpu.CompilerParams(
            dimension_semantics=("parallel", "parallel", "arbitrary"),
            vmem_limit_bytes=_vmem_limit_bytes(),
        ),
    )(x, w_t, b.reshape(1, n))


# ----------------------------------------------------------------------------
# Kernel 2: flash-style attention core over the lane-dense QKV slab.
#   qkv: (B*T, 3E) bf16, batch-major rows (row = b*T + t), columns [q | k | v].
#   Grid (B, head_groups, T/tq, S/tk); kv axis last is the online-softmax reduction.
#   Per step: q block (tq, G*D), k/v blocks (tk, G*D); m/l/acc scratch per head.
# ----------------------------------------------------------------------------
def _make_flash_kernel(group_heads, head_dim):
    def kernel(q_ref, k_ref, v_ref, o_ref, m_ref, l_ref, acc_ref):
        ki = pl.program_id(3)

        @pl.when(ki == 0)
        def _():
            m_ref[...] = jnp.full_like(m_ref, -jnp.inf)
            l_ref[...] = jnp.zeros_like(l_ref)
            acc_ref[...] = jnp.zeros_like(acc_ref)

        # Small static loop over the heads of this group (G = 128 // head_dim).
        # Each head's (tq, tk) score tile is consumed before the next head starts
        # and all running state lives in VMEM scratch, so live ranges stay bounded.
        for g in range(group_heads):
            lo, hi = g * head_dim, (g + 1) * head_dim
            q = q_ref[:, lo:hi]                                   # (tq, D) bf16
            k = k_ref[:, lo:hi]                                   # (tk, D) bf16
            v = v_ref[:, lo:hi]                                   # (tk, D) bf16
            s = lax.dot_general(                                  # (tq, tk) f32
                q, k,
                dimension_numbers=(((1,), (1,)), ((), ())),
                preferred_element_type=jnp.float32)
            m_prev = m_ref[g]                                     # (tq, 1)
            m_new = jnp.maximum(m_prev, jnp.max(s, axis=-1, keepdims=True))
            alpha = jnp.exp(m_prev - m_new)                       # old-state rescale
            p = jnp.exp(s - m_new)                                # f32 softmax numer
            l_ref[g] = alpha * l_ref[g] + jnp.sum(p, axis=-1, keepdims=True)
            pv = jnp.dot(p.astype(jnp.bfloat16), v,
                         preferred_element_type=jnp.float32)      # (tq, D)
            acc_ref[:, lo:hi] = alpha * acc_ref[:, lo:hi] + pv
            m_ref[g] = m_new

        @pl.when(ki == pl.num_programs(3) - 1)
        def _():
            # Normalize per head, then a single lane-dense (tq, G*D) store.
            outs = []
            for g in range(group_heads):
                lo, hi = g * head_dim, (g + 1) * head_dim
                inv = pl.reciprocal(l_ref[g], approx=True)        # EUP slot
                outs.append(acc_ref[:, lo:hi] * inv)
            o_ref[...] = jnp.concatenate(outs, axis=-1).astype(o_ref.dtype)

    return kernel


def flash_attention(qkv, bsz, seq_len, num_heads, head_dim, *, tq=128, tkv=128):
    """qkv: (B*T, 3E) bf16 batch-major -> attention output (B*T, E) bf16."""
    embed_dim = num_heads * head_dim
    g = _head_group_size(num_heads, head_dim)
    gd = g * head_dim
    n_col = embed_dim // gd                      # head-group column blocks per E
    tq = _pick_tile(seq_len, tq, 8)
    tkv = _pick_tile(seq_len, tkv, 8)
    nq, nk = seq_len // tq, seq_len // tkv
    grid = (bsz, n_col, nq, nk)                  # kv (reduction) axis last

    return pl.pallas_call(
        _make_flash_kernel(g, head_dim),
        out_shape=jax.ShapeDtypeStruct((bsz * seq_len, embed_dim), jnp.bfloat16),
        grid_spec=pltpu.PrefetchScalarGridSpec(
            num_scalar_prefetch=0,
            grid=grid,
            in_specs=[
                # q / k / v are disjoint 128-lane column groups of the same slab;
                # the q block index is constant across ki so it is fetched once.
                pl.BlockSpec((tq, gd), lambda b, hg, qi, ki: (b * nq + qi, hg)),
                pl.BlockSpec((tkv, gd), lambda b, hg, qi, ki: (b * nk + ki, n_col + hg)),
                pl.BlockSpec((tkv, gd), lambda b, hg, qi, ki: (b * nk + ki, 2 * n_col + hg)),
            ],
            out_specs=pl.BlockSpec((tq, gd), lambda b, hg, qi, ki: (b * nq + qi, hg)),
            scratch_shapes=[
                pltpu.VMEM((g, tq, 1), jnp.float32),   # running max per head
                pltpu.VMEM((g, tq, 1), jnp.float32),   # running denom per head
                pltpu.VMEM((tq, gd), jnp.float32),     # f32 output accumulator
            ],
        ),
        compiler_params=pltpu.CompilerParams(
            dimension_semantics=("parallel", "parallel", "parallel", "arbitrary"),
            vmem_limit_bytes=_vmem_limit_bytes(),
        ),
    )(qkv, qkv, qkv)


# ----------------------------------------------------------------------------
# Parameter prep (one-time, amortized) + module wrapper.
# ----------------------------------------------------------------------------
def prepare_params(params, embed_dim, num_heads):
    """PyTorch-layout f32 params -> kernel-ready params: bf16, (K,N) weights,
    1/sqrt(head_dim) folded into the Q rows of in_proj weight/bias."""
    head_dim = embed_dim // num_heads
    scaling = head_dim ** (-0.5)
    row_scale = jnp.concatenate(
        [jnp.full((embed_dim,), scaling, jnp.float32),
         jnp.ones((2 * embed_dim,), jnp.float32)])
    in_w = params["in_proj_weight"] * row_scale[:, None]          # (3E, E)
    in_b = params["in_proj_bias"] * row_scale                     # (3E,)
    return {
        "in_w_t": jnp.asarray(in_w.T, jnp.bfloat16),              # (E, 3E) bf16
        "in_b": jnp.asarray(in_b, jnp.float32),
        "out_w_t": jnp.asarray(params["out_proj_weight"].T, jnp.bfloat16),  # (E, E)
        "out_b": jnp.asarray(params["out_proj_bias"], jnp.float32),
    }


def multihead_attention(query, key, value, prepared, num_heads):
    """query/key/value: (T, B, E) float32.  Returns (attn (T, B, E) f32, None)."""
    tgt_len, bsz, embed_dim = query.shape
    head_dim = embed_dim // num_heads

    # Covered path: self-attention (qkv_same), mirroring the data_ptr() fast path.
    # TODO(synk): cross-attention (kv_same / distinct q,k,v), key_padding_mask,
    # attn_mask, dropout, need_weights and incremental_state are not implemented;
    # this object-identity gate (like PyTorch's data_ptr check) can reject
    # value-equal tensors passed as separate arrays.
    if key is not query or value is not query:
        raise NotImplementedError("only the self-attention (qkv_same) path is implemented")

    # Single fused relayout+cast at the module boundary: (T,B,E) f32 -> batch-major
    # bf16 (B*T, E).  Everything downstream reshapes freely between (B*T, X) and
    # (B, T, X) lane-dense slabs, so no padded (B,*) / (H,D) tiled layouts appear.
    x = jnp.transpose(query, (1, 0, 2)).astype(jnp.bfloat16)
    x = x.reshape(bsz * tgt_len, embed_dim)

    # Fused QKV projection -> (B*T, 3E) bf16.
    qkv = linear(x, prepared["in_w_t"], prepared["in_b"], out_dtype=jnp.bfloat16)

    # Flash-style attention core -> (B*T, E) bf16 (heads concatenated on lanes).
    attn = flash_attention(qkv, bsz, tgt_len, num_heads, head_dim)

    # Output projection -> (B*T, E) f32, then back to the module's (T, B, E) layout.
    out = linear(attn, prepared["out_w_t"], prepared["out_b"], out_dtype=jnp.float32)
    out = jnp.transpose(out.reshape(bsz, tgt_len, embed_dim), (1, 0, 2))
    return out, None   # need_weights=False


# ----------------------------------------------------------------------------
# Deterministic init (mirrors reset_parameters), pure-JAX reference, smoke run.
# ----------------------------------------------------------------------------
def init_params(key, embed_dim):
    k1, k2 = jax.random.split(key)
    return {
        "in_proj_weight": 0.02 * jax.random.normal(k1, (3 * embed_dim, embed_dim), jnp.float32),
        "in_proj_bias": jnp.zeros((3 * embed_dim,), jnp.float32),
        "out_proj_weight": 0.02 * jax.random.normal(k2, (embed_dim, embed_dim), jnp.float32),
        "out_proj_bias": jnp.zeros((embed_dim,), jnp.float32),
    }


def _reference(query, key, value, params, num_heads):
    """Pure-JAX f32 reference mirroring the PyTorch forward."""
    in_w, in_b = params["in_proj_weight"], params["in_proj_bias"]
    out_w, out_b = params["out_proj_weight"], params["out_proj_bias"]
    t, b, e = query.shape
    s = key.shape[0]
    hd = e // num_heads
    q = query @ in_w[:e].T + in_b[:e]
    k = key @ in_w[e:2 * e].T + in_b[e:2 * e]
    v = value @ in_w[2 * e:].T + in_b[2 * e:]
    q = (q * hd ** -0.5).reshape(t, b * num_heads, hd).transpose(1, 0, 2)
    k = k.reshape(s, b * num_heads, hd).transpose(1, 0, 2)
    v = v.reshape(s, b * num_heads, hd).transpose(1, 0, 2)
    w = jax.nn.softmax(jnp.einsum("ntd,nsd->nts", q, k), axis=-1)
    a = jnp.einsum("nts,nsd->ntd", w, v)
    a = a.transpose(1, 0, 2).reshape(t, b, e)
    return a @ out_w.T + out_b


if __name__ == "__main__":
    T, B, E, H = 16, 2, 128, 4   # seq=16, batch=2, embed=128, heads=4 (head_dim=32)
    key0 = jax.random.PRNGKey(0)
    kx, kp = jax.random.split(key0)
    x = jax.random.normal(kx, (T, B, E), jnp.float32)   # Time x Batch x Channel
    params = init_params(kp, E)
    prepared = prepare_params(params, E, H)

    # self-attention: query == key == value (qkv_same path)
    out, _ = multihead_attention(x, x, x, prepared, num_heads=H)
    out = jax.block_until_ready(out)

    ref = _reference(x, x, x, params, num_heads=H)
    assert out.shape == (T, B, E)
    max_err = float(jnp.max(jnp.abs(out - ref)))
    # bf16 weights/intermediates + approximate softmax reciprocal -> small expected
    # deviation from the pure-f32 reference.
    assert max_err < 2e-2, f"mismatch vs reference: max abs err {max_err}"

    print("KERNEL_OK")
</pallas_src>

<mosaic_0001>
module attributes {stable_mosaic.version = 11 : i64} {
  func.func @_linear_kernel(%arg0: i32, %arg1: i32, %arg2: i32, %arg3: memref<32x128xbf16, #tpu.memory_space<vmem>>, %arg4: memref<128x128xbf16, #tpu.memory_space<vmem>>, %arg5: memref<1x128xf32, #tpu.memory_space<vmem>>, %arg6: memref<32x128xbf16, #tpu.memory_space<vmem>>, %arg7: memref<32x128xf32, #tpu.memory_space<vmem>>) attributes {dimension_semantics = [#tpu.dimension_semantics<parallel>, #tpu.dimension_semantics<parallel>, #tpu.dimension_semantics<arbitrary>], iteration_bounds = array<i64: 1, 3, 1>, scalar_prefetch = 0 : i64, scratch_operands = 1 : i64, tpu.core_type = #tpu.core_type<tc>, window_params = [{transform_indices = @transform_0, window_bounds = array<i64: 32, 128>}, {transform_indices = @transform_1, window_bounds = array<i64: 128, 128>}, {transform_indices = @transform_2, window_bounds = array<i64: 1, 128>}, {transform_indices = @transform_3, window_bounds = array<i64: 32, 128>}]} {
    %c0_i32 = arith.constant 0 : i32
    %0 = arith.cmpi eq, %arg2, %c0_i32 : i32
    %1 = arith.extui %0 : i1 to i32
    %c0_i32_0 = arith.constant 0 : i32
    %2 = arith.cmpi ne, %1, %c0_i32_0 : i32
    scf.if %2 {
      %cst_10 = arith.constant 0.000000e+00 : f32
      %12 = vector.broadcast %cst_10 : f32 to vector<32x128xf32>
      %c0_11 = arith.constant 0 : index
      %c0_12 = arith.constant 0 : index
      %13 = vector.load %arg7[%c0_11, %c0_12] : memref<32x128xf32, #tpu.memory_space<vmem>>, vector<32x128xf32>
      tpu.vector_store %arg7[%c0_11, %c0_12], %12 {strides = array<i32>} : memref<32x128xf32, #tpu.memory_space<vmem>>, vector<32x128xf32>,
    } else {
    }
    %c0 = arith.constant 0 : index
    %c0_1 = arith.constant 0 : index
    %3 = vector.load %arg7[%c0, %c0_1] : memref<32x128xf32, #tpu.memory_space<vmem>>, vector<32x128xf32>
    %c0_2 = arith.constant 0 : index
    %c0_3 = arith.constant 0 : index
    %4 = vector.load %arg3[%c0_2, %c0_3] : memref<32x128xbf16, #tpu.memory_space<vmem>>, vector<32x128xbf16>
    %c0_4 = arith.constant 0 : index
    %c0_5 = arith.constant 0 : index
    %5 = vector.load %arg4[%c0_4, %c0_5] : memref<128x128xbf16, #tpu.memory_space<vmem>>, vector<128x128xbf16>
    %cst = arith.constant dense<0.000000e+00> : vector<32x128xf32>
    %6 = tpu.matmul %4, %5, %cst {dimension_numbers = #tpu.dot_dimension_numbers<[1], [0], [0], [1], [0, 0, 1, 1], [], []>} : vector<32x128xbf16>, vector<128x128xbf16>, vector<32x128xf32> -> vector<32x128xf32>
    %7 = arith.addf %3, %6 : vector<32x128xf32>
    %c0_6 = arith.constant 0 : index
    %c0_7 = arith.constant 0 : index
    %8 = vector.load %arg7[%c0_6, %c0_7] : memref<32x128xf32, #tpu.memory_space<vmem>>, vector<32x128xf32>
    tpu.vector_store %arg7[%c0_6, %c0_7], %7 {strides = array<i32>} : memref<32x128xf32, #tpu.memory_space<vmem>>, vector<32x128xf32>,
    %c0_i32_8 = arith.constant 0 : i32
    %9 = arith.cmpi eq, %arg2, %c0_i32_8 : i32
    %10 = arith.extui %9 : i1 to i32
    %c0_i32_9 = arith.constant 0 : i32
    %11 = arith.cmpi ne, %10, %c0_i32_9 : i32
    scf.if %11 {
      %c0_10 = arith.constant 0 : index
      %c0_11 = arith.constant 0 : index
      %12 = vector.load %arg7[%c0_10, %c0_11] : memref<32x128xf32, #tpu.memory_space<vmem>>, vector<32x128xf32>
      %c0_12 = arith.constant 0 : index
      %c0_13 = arith.constant 0 : index
      %13 = vector.load %arg5[%c0_12, %c0_13] : memref<1x128xf32, #tpu.memory_space<vmem>>, vector<1x128xf32>
      %14 = vector.broadcast %13 : vector<1x128xf32> to vector<32x128xf32>
      %15 = arith.addf %12, %14 : vector<32x128xf32>
      %16 = arith.truncf %15 : vector<32x128xf32> to vector<32x128xbf16>
      %c0_14 = arith.constant 0 : index
      %c0_15 = arith.constant 0 : index
      %17 = vector.load %arg6[%c0_14, %c0_15] : memref<32x128xbf16, #tpu.memory_space<vmem>>, vector<32x128xbf16>
      tpu.vector_store %arg6[%c0_14, %c0_15], %16 {strides = array<i32>} : memref<32x128xbf16, #tpu.memory_space<vmem>>, vector<32x128xbf16>,
    } else {
    }
    return
  }
  func.func @transform_0(%arg0: i32, %arg1: i32, %arg2: i32) -> (i32, i32) {
    %c0_i32 = arith.constant 0 : i32
    return %arg0, %arg2 : i32, i32
  }
  func.func @transform_1(%arg0: i32, %arg1: i32, %arg2: i32) -> (i32, i32) {
    %c0_i32 = arith.constant 0 : i32
    return %arg2, %arg1 : i32, i32
  }
  func.func @transform_2(%arg0: i32, %arg1: i32, %arg2: i32) -> (i32, i32) {
    %c0_i32 = arith.constant 0 : i32
    %c0_i32_0 = arith.constant 0 : i32
    return %c0_i32, %arg1 : i32, i32
  }
  func.func @transform_3(%arg0: i32, %arg1: i32, %arg2: i32) -> (i32, i32) {
    %c0_i32 = arith.constant 0 : i32
    return %arg0, %arg1 : i32, i32
  }
}

</mosaic_0001>

<bundles_post_ra>
// kernel: tpu_custom_call.1
= control target key start
LH: loop header
LB: loop body
LE: loop exit
PB: predicated region body
PF: predicated region fallthrough
CT: control target
= control target key end

     0   :  { %8 = vsyncpa [#allocation4], 0  ;;  %s1135_s0 = inlined_call_operand.hbm [shape: bf16[32,128], index: 0, kind: input, shape index: {}]   ;;  %s1136_s1 = inlined_call_operand.hbm [shape: bf16[128,384], index: 1, kind: input, shape index: {}]   ;;  %s1137_s2 = inlined_call_operand.vmem [shape: f32[1,384], index: 2, kind: input, shape index: {}]   ;;  %s1138_s3 = inlined_call_operand.hbm [shape: bf16[32,384], index: 3, kind: output, shape index: {}]  }
   0x1   :  { %9 = vsyncpa [#allocation7], 0 }
   0x2   :  { %11 = vsyncpa [#allocation7 + $0x1], 0 }
   0x3   :  { %12 = vsyncpa [#allocation5], 0 }
   0x4   :  { %14 = vsyncpa [#allocation5 + $0x1], 0  ;;  %s913_s12 = smov 0   ;;  %s915_s13 = smov 0  }
   0x5   :  { %s917_s14 = smov 0   ;;  %s919_s15 = smov 0  }
   0x6   :  { %s921_s16 = smov 0   ;;  %s923_s17 = smov 0  }
   0x7 LB: > { %s574_s18 = sadd.s32 4294967295, %s882_s17   ;;  %s575_s19 = sadd.s32 4294967294, %s882_s17   ;;  %s882_s17 = sphi %s923_s17, %s20_s17   ;;  %s878_s16 = sphi %s921_s16, %s1165_s16   ;;  %s874_s15 = sphi %s919_s15, %s1164_s15   ;;  %s870_s14 = sphi %s917_s14, %s1163_s14   ;;  %s866_s13 = sphi %s915_s13, %s1162_s13   ;;  %s862_s12 = sphi %s913_s12, %s1161_s12  }
   0x8   : > { %p83_p0 = scmp.ne.s32.totalorder %s870_s14, %s866_s13  ;;  %p84_p1 = scmp.eq.s32.totalorder %s882_s17, 0 }
   0x9   : > { %p89_p2 = scmp.ne.s32.totalorder %s866_s13, %s862_s12  ;;  %p950_p3 = scmp.eq.s32.totalorder %s574_s18, 0 }
   0xa   : > { %p954_p4 = por %p84_p1, %p83_p0  ;;  %p141_p5 = scmp.eq.s32.totalorder %s574_s18, 2 }
   0xb   : > { %s1146_s20 = scalar_select %p950_p3, 1, 0 }
   0xc   : > { %p960_p6 = por %p950_p3, %p89_p2  ;;  %p147_p7 = scmp.eq.s32.totalorder %s575_s19, 2 }
   0xd   : > { %p964_p8 = por %p141_p5, %p83_p0  ;;  %p576_p9 = scmp.ge.s32.totalorder %s882_s17, 1 }
   0xe   : > { %s1148_s22 = scalar_select %p960_p6, 1, 0 }
   0xf   : > { %s1149_s23 = scalar_select %p964_p8, 1, 0 }
  0x10   : > { %p969_p10 = por %p147_p7, %p89_p2  ;;  %p154_p11 = scmp.lt.s32.totalorder %s882_s17, 4 }
  0x11   : > { %s884_s26 = smov [#allocation3]   ;;  %p670_p0 = scmp.lt.s32.totalorder %s882_s17, 3 }
  0x12   : > { %s1150_s24 = scalar_select %p969_p10, 1, 0 }
  0x13   : > { %p974_p12 = pnand %p576_p9, %p154_p11  ;;  %s170_s27 = sshll.u32 %s884_s26, 4  ;;  %s171_s27 = int_to_ptr.vmem [resolvable:$true] %s170_s27 }
  0x14   : > { %p989_p2 = pnand %p670_p0, %p954_p4  ;;  %s35_s30 = sadd.s32 1, %s878_s16 }
  0x15   : > { %s1151_s25 = scalar_select %p974_p12, 1, 0 }
  0x16   : > { %p657_p13 = pneg %p974_p12  ;;  %s738_s6 = scalar_lea.hbm %s1135_s0, 256 }
  0x17   : > { %s1153_s29 = scalar_select %p989_p2, 1, 0 }
  0x18   : > { %p983_p1 = pnand %p657_p13, %p950_p3  ;;  %p739_p5 = scmp.ne.s32.totalorder %s1135_s0, %s738_s6 }
  0x19   : > { %p745_p4 = scmp.lt.u32.totalorder %s738_s6, %s1135_s0 }
  0x1a   : > { %p740_p7 = pneg %p983_p1 }
  0x1c   : > { %p741_p9 = pnand %p740_p7, %p739_p5 }
  0x1e   : > { %p742_p11 = pneg %p741_p9 }
  0x20   : > { %p747_p13 = pnand %p745_p4, %p742_p11 }
  0x22   : > { %750 = shalt.err (!%p747_p13)
}
  0x23   : > { %s751_s11 = scalar_lea.vmem %s171_s27, 256  ;;  %p759_p6 = scmp.lt.s32.totalorder %s171_s27, %s171_s27 }
  0x24   : > { %p752_p0 = scmp.ne.s32.totalorder %s171_s27, %s751_s11  ;;  %p760_p3 = scmp.lt.s32.totalorder %s751_s11, %s751_s11 }
  0x26   : > { %p754_p10 = pnand %p752_p0, %p740_p7  ;;  %p761_p12 = por %p760_p3, %p759_p6 }
  0x28   : > { %p755_p8 = pneg %p754_p10 }
  0x2a   : > { %p762_p2 = pnand %p761_p12, %p755_p8 }
  0x2c   : > { %765 = shalt.err (!%p762_p2)
}
  0x2d   : > { %s1145_s18 = smov 64   ;;  %s886_s19 = smov 4  }
  0x2e   : > { %660 = dma.hbm_to_vmem [thread:$0]  (!%p983_p1), %s1135_s0, 256, %s171_s27, [#allocation4], %s1145_s18, %s1145_s18, %s886_s19  }
  0x2f   : > { %p37_p10 = scmp.ge.s32.totalorder %s35_s30, 3  ;;  %s76_s4 = sadd.s32 1, %s870_s14 }
  0x30   : > { %s184_s5 = sand.u32 1, %s870_s14   ;;  %s580_s8 = sshll.u32 %s878_s16, 6 }
  0x31   : > { %s1167_s30 = smov (%p37_p10, %s35_s30), 0  ;;  %s579_s6 = sshll.u32 %s184_s5, 6 }
  0x32   : > { %s72_s7 = ssub.s32 %s878_s16, %s1167_s30  ;;  %s1023_s10 = scalar_lea.hbm %s1136_s1, %s580_s8 }
  0x33   : > { %p74_p3 = scmp.eq.s32.totalorder %s72_s7, 0  ;;  %s188_s27 = scalar_lea.vmem [#allocation6], %s579_s6 }
  0x34   : > { %s197_s11 = sshll.u32 %s188_s27, 4  ;;  %s1030_s26 = scalar_lea.sflag [#allocation7], %s184_s5  ;;  %s1028_s11 = int_to_ptr.vmem [resolvable:$true] %s197_s11 }
  0x35   : > { %s1026_s21 = scalar_select %p74_p3, %s870_s14, %s76_s4  }
  0x36   : > { %s766_s18 = scalar_lea.hbm %s1023_s10, 1024  ;;  %p1154_p8 = scmp.ne.s32.totalorder %s1153_s29, 0 }
  0x37   : > { %p767_p6 = scmp.ne.s32.totalorder %s1023_s10, %s766_s18  ;;  %s771_s28 = scalar_lea.hbm %s1136_s1, 3072 }
  0x38   : > { %p768_p12 = pneg %p1154_p8  ;;  %p772_p5 = scmp.lt.u32.totalorder %s1023_s10, %s1136_s1 }
  0x39   : > { %p773_p7 = scmp.lt.u32.totalorder %s771_s28, %s766_s18  ;;  %p775_p11 = scmp.lt.u32.totalorder %s766_s18, %s1023_s10 }
  0x3a   : > { %p769_p1 = pnand %p768_p12, %p767_p6 }
  0x3b   : > { %p774_p9 = por %p773_p7, %p772_p5 }
  0x3c   : > { %p770_p2 = pneg %p769_p1 }
  0x3d   : > { %p776_p4 = por %p775_p11, %p774_p9 }
  0x3f   : > { %p777_p13 = pnand %p776_p4, %p770_p2 }
  0x41   : > { %780 = shalt.err (!%p777_p13)
}
  0x42   : > { %s781_s4 = scalar_lea.vmem %s1028_s11, 1024  ;;  %s887_s5 = smov [#allocation6]  }
  0x43   : > { %p782_p0 = scmp.ne.s32.totalorder %s1028_s11, %s781_s4  ;;  %s786_s27 = sshll.u32 %s887_s5, 4  ;;  %s787_s27 = int_to_ptr.vmem [resolvable:$false] %s786_s27 }
  0x44   : > { %s788_s7 = scalar_lea.vmem %s787_s27, 2048  ;;  %p789_p6 = scmp.lt.s32.totalorder %s1028_s11, %s787_s27 }
  0x45   : > { %p784_p10 = pnand %p782_p0, %p768_p12  ;;  %p790_p1 = scmp.lt.s32.totalorder %s788_s7, %s781_s4 }
  0x47   : > { %p785_p3 = pneg %p784_p10  ;;  %p791_p5 = por %p790_p1, %p789_p6 }
  0x49   : > { %p792_p7 = pnand %p791_p5, %p785_p3 }
  0x4b   : > { %795 = shalt.err (!%p792_p7)
}
  0x4c   : > { %s888_s18 = smov 192   ;;  %s1155_s8 = smov 64  }
  0x4d   : > { %664 = dma.hbm_to_vmem [thread:$0]  (!%p1154_p8), %s1023_s10, 1024, %s1028_s11, %s1030_s26, %s888_s18, %s1155_s8, %s886_s19  }
  0x4e   : > { %p1156_p12 = scmp.ne.s32.totalorder %s1151_s25, 0 }
  0x4f   : > { %p1157_p2 = scmp.ne.s32.totalorder (!%p1156_p12), %s1146_s20, 0 }
  0x50   : > { %215 = sbr.rel (%p1156_p12) target bundleno = 360 (0x168), region = 32 }
  0x57   : > { %849 = dma.done.wait (%p1157_p2), [#allocation4], 256  }
  0x58   : > { %851 = vsyncadd (%p1157_p2), [#allocation4], 4294967040  ;;  %s1067_s28 = sand.u32 1, %s866_s13   ;;  %p1158_p9 = scmp.ne.s32.totalorder %s1148_s22, 0 }
  0x59   : > { %s583_s29 = sshll.u32 %s1067_s28, 6  ;;  %s222_s6 = scalar_lea.sflag [#allocation7], %s1067_s28 }
  0x5a   : > { %s225_s9 = scalar_lea.vmem [#allocation6], %s583_s29 }
  0x5b   : > { %853 = dma.done.wait (%p1158_p9), %s222_s6, 1024  }
  0x5c   : > { %855 = vsyncadd (%p1158_p9), %s222_s6, 4294966272  ;;  %v728_v0 = vld [vmem:[%s225_s9] sm:$0xff]   ;;  %v729_v1 = vld [vmem:[%s225_s9 + $0x8] sm:$0xff]   ;;  %p253_p8 = scmp.lt.s32.totalorder %s874_s15, 2  ;;  %s584_s22 = sshll.u32 %s1067_s28, 4 }
  0x5d   : > { %629 = vmatprep.subr.bf16.mxu0 %v728_v0  ;;  %v730_v2 = vld [vmem:[%s225_s9 + $0x10] sm:$0xff]   ;;  %v731_v3 = vld [vmem:[%s225_s9 + $0x18] sm:$0xff]   ;;  %v732_v5 = vld [vmem:[%s225_s9 + $0x20] sm:$0xff]   ;;  %s250_s11 = scalar_lea.vmem [#allocation8], %s584_s22  ;;  %s601_s4 = sshll.u32 %s874_s15, 6 }
  0x5e   : > { %630 = vmatpush3.bf16.msra.mxu0 %v728_v0  ;;  %v736_v4 = vld [vmem:[#allocation3] sm:$0xff]   ;;  %v733_v6 = vld [vmem:[%s225_s9 + $0x28] sm:$0xff]   ;;  %v735_v8 = vld [vmem:[%s225_s9 + $0x38] sm:$0xff]   ;;  %s254_s20 = scalar_select %p253_p8, %s874_s15, 2 }
  0x5f   : > { %631 = vmatprep.subr.bf16.mxu0 %v729_v1  ;;  %645 = vmatprep.mubr.bf16.mxu0 %v736_v4  ;;  %v734_v7 = vld [vmem:[%s225_s9 + $0x30] sm:$0xff]   ;;  %v737_v9 = vld [vmem:[#allocation3 + $0x8] sm:$0xff]   ;;  %s461_s26 = sshll.u32 %s250_s11, 4  ;;  %s1087_s7 = scalar_lea.hbm %s1138_s3, %s601_s4  ;;  %s1082_s26 = int_to_ptr.vmem [resolvable:$true] %s461_s26 }
  0x60   : > { %s255_s10 = scalar_lea.vmem %s1137_s2, %s254_s20  ;;  %s446_s15 = scalar_lea.sflag [#allocation5], %s1067_s28 }
  0x61   : > { %v595_v11 = vld [vmem:[%s255_s10] ss:$0 sm:$0xff]  ;;  %s796_s18 = scalar_lea.vmem %s1082_s26, 256  ;;  %p1159_p4 = scmp.ne.s32.totalorder %s1149_s23, 0 }
  0x62   : > { %632 = vmatpush3.bf16.msra.mxu0 %v729_v1  ;;  %p797_p11 = scmp.ne.s32.totalorder %s1082_s26, %s796_s18  ;;  %s889_s8 = smov [#allocation8]  }
  0x63   : > { %633 = vmatprep.subr.bf16.mxu0 %v730_v2  ;;  %s800_s29 = sshll.u32 %s889_s8, 4  ;;  %s801_s29 = int_to_ptr.vmem [resolvable:$false] %s800_s29 }
  0x64   : > { %p798_p13 = pnand %p797_p11, %p1159_p4  ;;  %s802_s6 = scalar_lea.vmem %s801_s29, 512 }
  0x65   : > { %p803_p10 = scmp.lt.s32.totalorder %s1082_s26, %s801_s29  ;;  %p804_p3 = scmp.lt.s32.totalorder %s802_s6, %s796_s18 }
  0x66   : > { %634 = vmatpush3.bf16.msra.mxu0 %v730_v2  ;;  %p799_p0 = pneg %p798_p13 }
  0x67   : > { %635 = vmatprep.subr.bf16.mxu0 %v731_v3  ;;  %p805_p6 = por %p804_p3, %p803_p10 }
  0x69   : > { %p806_p1 = pnand %p805_p6, %p799_p0 }
  0x6a   : > { %636 = vmatpush3.bf16.msra.mxu0 %v731_v3 }
  0x6b   : > { %637 = vmatprep.subr.bf16.mxu0 %v732_v5 }
  0x6e   : > { %638 = vmatpush3.bf16.msra.mxu0 %v732_v5 }
  0x6f   : > { %639 = vmatprep.subr.bf16.mxu0 %v733_v6 }
  0x72   : > { %640 = vmatpush3.bf16.msra.mxu0 %v733_v6 }
  0x73   : > { %641 = vmatprep.subr.bf16.mxu0 %v734_v7 }
  0x76   : > { %642 = vmatpush3.bf16.msra.mxu0 %v734_v7 }
  0x77   : > { %643 = vmatprep.subr.bf16.mxu0 %v735_v8 }
  0x7a   : > { %644 = vmatpush3.bf16.msra.mxu0 %v735_v8 }
  0x7d   : > { %646 = vmatmul.mubr.bf16.vlgmr.msra.gmra.mrb[0].mxu0 %v737_v9 }
 0x150   : > { %v647_v10 = vpop.f32.mrb[0].mxu0 }
 0x151   : > { %v384_v12 = vpop.f32.mrb[1].mxu0  ;;  %v423_v14 = vadd.f32 %v647_v10, %v595_v11 }
 0x152   : > { %v648_v13 = vpop.f32.mrb[2].mxu0  ;;  %v421_v17 = vadd.f32 %v595_v11, %v384_v12 }
 0x153   : > { %v424_v15 = vadd.f32 %v648_v13, %v595_v11  ;;  %v387_v16 = vpop.f32.mrb[3].mxu0 }
 0x154   : > { %v422_v18 = vadd.f32 %v595_v11, %v387_v16 }
 0x155   : > { %v616_v19 = vpack.c.bf16 %v424_v15, %v423_v14 }
 0x156   : > { %v611_v20 = vpack.c.bf16 %v422_v18, %v421_v17 }
 0x157   : > { %618 = vst [vmem:[%s250_s11 + $0x8] sm:$0xff] %v616_v19  }
 0x158   : > { %612 = vst [vmem:[%s250_s11] sm:$0xff] %v611_v20  }
 0x159   : > { %809 = shalt.err (!%p806_p1)
}
 0x15a   : > { %s810_s9 = scalar_lea.hbm %s1087_s7, 256  ;;  %s814_s25 = scalar_lea.hbm %s1138_s3, 768 }
 0x15b   : > { %p811_p5 = scmp.ne.s32.totalorder %s1087_s7, %s810_s9  ;;  %p815_p2 = scmp.lt.u32.totalorder %s1087_s7, %s1138_s3 }
 0x15c   : > { %p816_p9 = scmp.lt.u32.totalorder %s814_s25, %s810_s9  ;;  %p818_p11 = scmp.lt.u32.totalorder %s810_s9, %s1087_s7 }
 0x15d   : > { %p812_p7 = pnand %p811_p5, %p1159_p4 }
 0x15e   : > { %p817_p8 = por %p816_p9, %p815_p2 }
 0x15f   : > { %p813_p12 = pneg %p812_p7 }
 0x160   : > { %p819_p13 = por %p818_p11, %p817_p8 }
 0x162   : > { %p820_p0 = pnand %p819_p13, %p813_p12 }
 0x164   : > { %823 = shalt.err (!%p820_p0)
}
 0x165   : > { %s890_s11 = smov 64   ;;  %s891_s4 = smov 192  }
 0x166   : > { %s892_s5 = smov 4  }
 0x167   : > { %655 = dma.vmem_to_hbm [thread:$0]  (%p1159_p4), %s1082_s26, 256, %s1087_s7, %s446_s15, %s890_s11, %s891_s4, %s892_s5  }
 0x168 PF: > { %p672_p10 = scmp.ge.s32.totalorder %s882_s17, 2  ;;  %s476_s27 = sand.u32 1, %s862_s12  }
 0x169   : > { %p1160_p3 = scmp.ne.s32.totalorder %s1150_s24, 0  ;;  %s477_s18 = scalar_lea.sflag [#allocation5], %s476_s27 }
 0x16b   : > { %p666_p6 = pnand %p672_p10, %p1160_p3 }
 0x16d   : > { %857 = dma.done.wait (!%p666_p6), %s477_s18, 256  }
 0x16e   : > { %859 = vsyncadd (!%p666_p6), %s477_s18, 4294967040  ;;  %s20_s17 = sadd.s32 1, %s882_s17   ;;  %s1161_s12 = smov %s866_s13 }
 0x16f   : > { %p17_p1 = scmp.ge.s32.totalorder %s20_s17, 5   ;;  %s1162_s13 = smov %s870_s14 }
 0x170   : > { %s1163_s14 = smov %s1026_s21  ;;  %s1164_s15 = smov %s878_s16 }
 0x171   : > { %s1165_s16 = smov %s1167_s30  ;;  %19 = sbr.rel (!%p17_p1) target bundleno = 7 (0x7), region = 94 }
 0x178   :  { %482 = vsyncpa [#allocation4], 1 }
 0x179   :  { %484 = vsyncpa [#allocation4 + $0x1], 1 }
 0x17a   :  { %485 = vsyncpa [#allocation7], 1 }
 0x17b   :  { %487 = vsyncpa [#allocation7 + $0x1], 1 }
 0x17c   :  { %488 = vsyncpa [#allocation5], 1 }
 0x17d   :  { %490 = vsyncpa [#allocation5 + $0x1], 1 }

</bundles_post_ra>
